<compile_context>
chip_gen: v7x
topology: tpu7x:2x2x1
jax: 0.10.0
libtpu: 0.0.40
codegen_flags: <defaults>
</compile_context>

<pallas_src>
import numpy as np

import jax
import jax.numpy as jnp
from jax.experimental import pallas as pl
from jax.experimental.pallas import tpu as pltpu


# ----------------------------------------------------------------------------
# Single fused Pallas kernel: the entire DisModality head.
#   h1 = relu(x  @ M1 + c1)   # conv1 (3x3, s2, p1) + ReLU   (conv folded to matmul)
#   h2 = relu(h1 @ M2 + c2)   # conv2 + ReLU                 (lane-padded to 128)
#   h3 = relu(h2 @ M3 + c3)   # conv3 + AdaptiveAvgPool2d(2,2) + Flatten + fc1 + ReLU
#   h4 = relu(h3 @ M4 + c4)   # fc2 + ReLU
#   y  =      h4 @ M5 + c5    # fc3  (lane-padded to 128; real result in col 0)
# Weights bf16, accumulation/bias/ReLU f32.  All operands resident in VMEM.
# ----------------------------------------------------------------------------
def _dis_modality_kernel(x_ref, m1_ref, m2_ref, m345_ref, c_ref, o_ref):
    f32, bf16 = jnp.float32, jnp.bfloat16
    n1 = m1_ref.shape[1]              # stage-1 width (multiple of 128)
    n2 = m2_ref.shape[1]              # stage-2 width (multiple of 128)
    o1, o2, o3, o4 = n1, n1 + n2, n1 + n2 + 128, n1 + n2 + 256

    h = jnp.dot(x_ref[...], m1_ref[...], preferred_element_type=f32) + c_ref[:, 0:n1]
    h = jnp.maximum(h, 0.0)
    h = jnp.dot(h.astype(bf16), m2_ref[...], preferred_element_type=f32) + c_ref[:, o1:o1 + n2]
    h = jnp.maximum(h, 0.0)
    h = jnp.dot(h.astype(bf16), m345_ref[:, 0:128], preferred_element_type=f32) + c_ref[:, o2:o2 + 128]
    h = jnp.maximum(h, 0.0)
    h = jnp.dot(h.astype(bf16), m345_ref[:, 128:256], preferred_element_type=f32) + c_ref[:, o3:o3 + 128]
    h = jnp.maximum(h, 0.0)
    y = jnp.dot(h.astype(bf16), m345_ref[:, 256:384], preferred_element_type=f32) + c_ref[:, o4:o4 + 128]
    o_ref[...] = y.astype(o_ref.dtype)


@jax.jit
def _dis_modality_jit(folded, x_nchw):
    B = x_nchw.shape[0]
    x_flat = jnp.reshape(x_nchw, (B, -1)).astype(jnp.bfloat16)  # free reshape (NCHW order)
    vmem = lambda: pl.BlockSpec(memory_space=pltpu.MemorySpace.VMEM)
    out = pl.pallas_call(
        _dis_modality_kernel,
        out_shape=jax.ShapeDtypeStruct((B, 128), jnp.float32),  # lane-dense output
        in_specs=[vmem() for _ in range(5)],                    # whole arrays resident in VMEM
        out_specs=vmem(),
    )(x_flat, folded["m1"], folded["m2"], folded["m345"], folded["c"])
    return out[:, :1]                                           # real fc3 result is column 0


def dis_modality(folded, x_nchw, with_grl=True):
    """ModelAPI.DisModality forward.

    GradientReversalLayer is an identity in the forward pass (with_grl only
    changes the backward pass in PyTorch), so it is a no-op here.
    """
    del with_grl
    return _dis_modality_jit(folded, x_nchw)


# ----------------------------------------------------------------------------
# One-time weight preprocessing (runs once at init, outside the hot path).
# ----------------------------------------------------------------------------
def _conv3x3_s2_p1_as_matrix(w_oihw, H, W, input_layout):
    """Dense matrix of the Conv2d(kernel=3, stride=2, padding=1) linear map.

    Rows index the flattened input ('chw' -> c*H*W + h*W + w,
    'hwc' -> (h*W + w)*C + c); columns index the output flattened as
    (oy*OW + ox)*OC + oc.
    """
    OC, IC, KH, KW = w_oihw.shape
    OH = (H - 1) // 2 + 1
    OW = (W - 1) // 2 + 1
    m = np.zeros((IC * H * W, OH * OW * OC), np.float64)
    for oy in range(OH):
        for kh in range(KH):
            ih = 2 * oy + kh - 1
            if ih < 0 or ih >= H:
                continue
            for ox in range(OW):
                for kw in range(KW):
                    iw = 2 * ox + kw - 1
                    if iw < 0 or iw >= W:
                        continue
                    col0 = (oy * OW + ox) * OC
                    for ic in range(IC):
                        if input_layout == "chw":
                            row = (ic * H + ih) * W + iw
                        else:  # "hwc"
                            row = (ih * W + iw) * IC + ic
                        m[row, col0:col0 + OC] = w_oihw[:, ic, kh, kw]
    return m


def _adaptive_pool2x2_flatten_matrix(C, H, W):
    """Linear map: (h,w,c)-flattened activation -> AdaptiveAvgPool2d((2,2))
    followed by nn.Flatten in PyTorch's (c, ph, pw) order (exact bin semantics)."""
    P = np.zeros((H * W * C, C * 4), np.float64)
    for ph in range(2):
        h0, h1 = (ph * H) // 2, ((ph + 1) * H + 1) // 2
        for pw in range(2):
            w0, w1 = (pw * W) // 2, ((pw + 1) * W + 1) // 2
            inv_area = 1.0 / ((h1 - h0) * (w1 - w0))
            for c in range(C):
                col = c * 4 + ph * 2 + pw
                for h in range(h0, h1):
                    for w in range(w0, w1):
                        P[(h * W + w) * C + c, col] = inv_area
    return P


def _pad_to(a, axis, mult):
    p = (-a.shape[axis]) % mult
    if p == 0:
        return a
    widths = [(0, 0)] * a.ndim
    widths[axis] = (0, p)
    return np.pad(a, widths)


def fold_params(params, H, W):
    """Fold convs (and conv3->pool->flatten->fc1) into dense matrices + biases,
    lane-pad every stage width to a multiple of 128, pack the fc matrices and
    all biases into single arrays, and cast weights to bf16."""
    C = params["conv1_b"].shape[0]
    g = lambda k: np.asarray(jax.device_get(params[k]), np.float64)

    OH1, OW1 = (H - 1) // 2 + 1, (W - 1) // 2 + 1
    OH2, OW2 = (OH1 - 1) // 2 + 1, (OW1 - 1) // 2 + 1
    OH3, OW3 = (OH2 - 1) // 2 + 1, (OW2 - 1) // 2 + 1

    m1 = _conv3x3_s2_p1_as_matrix(g("conv1_w"), H, W, "chw")      # (C*H*W, OH1*OW1*C)
    c1 = np.tile(g("conv1_b"), OH1 * OW1)
    m2 = _conv3x3_s2_p1_as_matrix(g("conv2_w"), OH1, OW1, "hwc")  # (OH1*OW1*C, OH2*OW2*C)
    c2 = np.tile(g("conv2_b"), OH2 * OW2)
    t3 = _conv3x3_s2_p1_as_matrix(g("conv3_w"), OH2, OW2, "hwc")  # (OH2*OW2*C, OH3*OW3*C)
    b3 = np.tile(g("conv3_b"), OH3 * OW3)
    pool = _adaptive_pool2x2_flatten_matrix(C, OH3, OW3)          # (OH3*OW3*C, 4*C)
    fc1_wt = g("fc1_w").T                                         # (4*C, 128)
    m3 = t3 @ pool @ fc1_wt                                       # (OH2*OW2*C, 128)
    c3 = b3 @ pool @ fc1_wt + g("fc1_b")
    m4 = g("fc2_w").T                                             # (128, 128)
    c4 = g("fc2_b")
    m5 = g("fc3_w").T                                             # (128, 1)
    c5 = g("fc3_b")

    # --- Lane-pad every stage width to a multiple of 128 (zero pads) --------
    # Padded matrix columns and bias entries are exactly 0, so ReLU keeps the
    # padded lanes at 0 and the zero-padded rows of the next matrix contribute
    # nothing: results on the real columns are unchanged.
    n1_real, n2_real = m1.shape[1], m2.shape[1]
    m1 = _pad_to(m1, 1, 128)
    c1 = _pad_to(c1, 0, 128)
    m2 = np.pad(m2, ((0, m1.shape[1] - m2.shape[0]), (0, 0)))     # zero rows for padded h1 lanes
    m2 = _pad_to(m2, 1, 128)
    c2 = _pad_to(c2, 0, 128)
    m3 = np.pad(m3, ((0, m2.shape[1] - m3.shape[0]), (0, 0)))     # zero rows for padded h2 lanes
    m5 = _pad_to(m5, 1, 128)
    c5 = _pad_to(c5, 0, 128)
    assert np.all(c1[n1_real:] == 0) and np.all(m1[:, n1_real:] == 0)
    assert np.all(c2[n2_real:] == 0) and np.all(m2[:, n2_real:] == 0)
    assert np.all(c5[1:] == 0) and np.all(m5[:, 1:] == 0)

    m345 = np.concatenate([m3, m4, m5], axis=1)                   # (n2_pad, 384)
    c_all = np.concatenate([c1, c2, c3, c4, c5])[None, :]         # (1, n1_pad + n2_pad + 384)

    # VMEM budget guard (review item 6): bf16 weights + f32 biases must sit
    # comfortably in scoped VMEM (v7x physical VMEM is only 64 MiB).
    folded_bytes = 2 * (m1.size + m2.size + m345.size) + 4 * c_all.size
    assert folded_bytes < (8 << 20), (
        f"folded weights = {folded_bytes} B; switch conv1 to a K-blocked grid "
        "before scaling (dense fold grows quadratically in C*H*W)")

    to_bf16 = lambda a: jnp.asarray(np.asarray(a, np.float32), jnp.bfloat16)
    return {
        "m1": to_bf16(m1),
        "m2": to_bf16(m2),
        "m345": to_bf16(m345),
        "c": jnp.asarray(np.asarray(c_all, np.float32)),
    }


# ----------------------------------------------------------------------------
# Parameters (deterministic synthetic init, PyTorch shape conventions)
# ----------------------------------------------------------------------------
def init_params(key, in_channels):
    C = in_channels
    ks = jax.random.split(key, 12)

    def nrm(k, shape, scale=0.1):
        return scale * jax.random.normal(k, shape, jnp.float32)

    return {
        "conv1_w": nrm(ks[0], (C, C, 3, 3)), "conv1_b": nrm(ks[1], (C,)),
        "conv2_w": nrm(ks[2], (C, C, 3, 3)), "conv2_b": nrm(ks[3], (C,)),
        "conv3_w": nrm(ks[4], (C, C, 3, 3)), "conv3_b": nrm(ks[5], (C,)),
        "fc1_w": nrm(ks[6], (128, C * 4)),   "fc1_b": nrm(ks[7], (128,)),
        "fc2_w": nrm(ks[8], (128, 128)),     "fc2_b": nrm(ks[9], (128,)),
        "fc3_w": nrm(ks[10], (1, 128)),      "fc3_b": nrm(ks[11], (1,)),
    }


def forward(params, x_nchw):
    # TODO(synk): TriUnet (self.model) is not defined in the provided source, so
    # ModelAPI.forward's (x, instance, modality) path cannot be reproduced.
    raise NotImplementedError("TriUnet submodule undefined in source module")


# ----------------------------------------------------------------------------
# Pure-JAX f32 reference for DisModality (correctness check only)
# ----------------------------------------------------------------------------
def _ref_dis_modality(params, x):
    def conv(x, w, b):
        y = jax.lax.conv_general_dilated(
            x, w, window_strides=(2, 2), padding=((1, 1), (1, 1)),
            dimension_numbers=("NCHW", "OIHW", "NCHW"))
        return y + b[None, :, None, None]

    x = jax.nn.relu(conv(x, params["conv1_w"], params["conv1_b"]))
    x = jax.nn.relu(conv(x, params["conv2_w"], params["conv2_b"]))
    x = conv(x, params["conv3_w"], params["conv3_b"])
    B, C, H, W = x.shape
    x = x.reshape(B, C, 2, H // 2, 2, W // 2).mean(axis=(3, 5)).reshape(B, C * 4)
    x = jax.nn.relu(x @ params["fc1_w"].T + params["fc1_b"])
    x = jax.nn.relu(x @ params["fc2_w"].T + params["fc2_b"])
    return x @ params["fc3_w"].T + params["fc3_b"]


if __name__ == "__main__":
    key = jax.random.PRNGKey(0)
    pkey, xkey = jax.random.split(key)

    batch, in_channels, H, W = 2, 4, 16, 16
    params = init_params(pkey, in_channels)
    folded = fold_params(params, H, W)          # one-time weight preprocessing
    x = jax.random.normal(xkey, (batch, in_channels, H, W), jnp.float32)

    out = jax.block_until_ready(dis_modality(folded, x, with_grl=True))

    ref = _ref_dis_modality(params, x)
    assert out.shape == (batch, 1), out.shape
    # Tolerance deliberately loosened vs the f32 reference because the folded
    # weights are stored in bf16 (review item 2); accumulation stays f32.
    assert jnp.allclose(out, ref, atol=2e-2, rtol=2e-2), (out, ref)

    print("KERNEL_OK")
</pallas_src>

<mosaic_0001>
module attributes {stable_mosaic.version = 11 : i64} {
  func.func @_dis_modality_kernel(%arg0: memref<2x1024xbf16, #tpu.memory_space<vmem>>, %arg1: memref<1024x256xbf16, #tpu.memory_space<vmem>>, %arg2: memref<256x128xbf16, #tpu.memory_space<vmem>>, %arg3: memref<128x384xbf16, #tpu.memory_space<vmem>>, %arg4: memref<1x768xf32, #tpu.memory_space<vmem>>, %arg5: memref<2x128xf32, #tpu.memory_space<vmem>>) attributes {dimension_semantics = [], scalar_prefetch = 0 : i64, scratch_operands = 0 : i64, tpu.core_type = #tpu.core_type<tc>} {
    %c0 = arith.constant 0 : index
    %c0_0 = arith.constant 0 : index
    %0 = vector.load %arg0[%c0, %c0_0] : memref<2x1024xbf16, #tpu.memory_space<vmem>>, vector<2x1024xbf16>
    %c0_1 = arith.constant 0 : index
    %c0_2 = arith.constant 0 : index
    %1 = vector.load %arg1[%c0_1, %c0_2] : memref<1024x256xbf16, #tpu.memory_space<vmem>>, vector<1024x256xbf16>
    %cst = arith.constant dense<0.000000e+00> : vector<2x256xf32>
    %2 = tpu.matmul %0, %1, %cst {dimension_numbers = #tpu.dot_dimension_numbers<[1], [0], [0], [1], [0, 0, 1, 1], [], []>} : vector<2x1024xbf16>, vector<1024x256xbf16>, vector<2x256xf32> -> vector<2x256xf32>
    %c0_3 = arith.constant 0 : index
    %c0_4 = arith.constant 0 : index
    %3 = vector.load %arg4[%c0_3, %c0_4] : memref<1x768xf32, #tpu.memory_space<vmem>>, vector<1x256xf32>
    %4 = vector.broadcast %3 : vector<1x256xf32> to vector<2x256xf32>
    %5 = arith.addf %2, %4 : vector<2x256xf32>
    %cst_5 = arith.constant 0.000000e+00 : f32
    %6 = vector.broadcast %cst_5 : f32 to vector<2x256xf32>
    %7 = arith.maximumf %5, %6 : vector<2x256xf32>
    %8 = arith.truncf %7 : vector<2x256xf32> to vector<2x256xbf16>
    %c0_6 = arith.constant 0 : index
    %c0_7 = arith.constant 0 : index
    %9 = vector.load %arg2[%c0_6, %c0_7] : memref<256x128xbf16, #tpu.memory_space<vmem>>, vector<256x128xbf16>
    %cst_8 = arith.constant dense<0.000000e+00> : vector<2x128xf32>
    %10 = tpu.matmul %8, %9, %cst_8 {dimension_numbers = #tpu.dot_dimension_numbers<[1], [0], [0], [1], [0, 0, 1, 1], [], []>} : vector<2x256xbf16>, vector<256x128xbf16>, vector<2x128xf32> -> vector<2x128xf32>
    %c0_9 = arith.constant 0 : index
    %c256 = arith.constant 256 : index
    %11 = vector.load %arg4[%c0_9, %c256] : memref<1x768xf32, #tpu.memory_space<vmem>>, vector<1x128xf32>
    %12 = vector.broadcast %11 : vector<1x128xf32> to vector<2x128xf32>
    %13 = arith.addf %10, %12 : vector<2x128xf32>
    %cst_10 = arith.constant 0.000000e+00 : f32
    %14 = vector.broadcast %cst_10 : f32 to vector<2x128xf32>
    %15 = arith.maximumf %13, %14 : vector<2x128xf32>
    %16 = arith.truncf %15 : vector<2x128xf32> to vector<2x128xbf16>
    %c0_11 = arith.constant 0 : index
    %c0_12 = arith.constant 0 : index
    %17 = vector.load %arg3[%c0_11, %c0_12] : memref<128x384xbf16, #tpu.memory_space<vmem>>, vector<128x128xbf16>
    %cst_13 = arith.constant dense<0.000000e+00> : vector<2x128xf32>
    %18 = tpu.matmul %16, %17, %cst_13 {dimension_numbers = #tpu.dot_dimension_numbers<[1], [0], [0], [1], [0, 0, 1, 1], [], []>} : vector<2x128xbf16>, vector<128x128xbf16>, vector<2x128xf32> -> vector<2x128xf32>
    %c0_14 = arith.constant 0 : index
    %c384 = arith.constant 384 : index
    %19 = vector.load %arg4[%c0_14, %c384] : memref<1x768xf32, #tpu.memory_space<vmem>>, vector<1x128xf32>
    %20 = vector.broadcast %19 : vector<1x128xf32> to vector<2x128xf32>
    %21 = arith.addf %18, %20 : vector<2x128xf32>
    %cst_15 = arith.constant 0.000000e+00 : f32
    %22 = vector.broadcast %cst_15 : f32 to vector<2x128xf32>
    %23 = arith.maximumf %21, %22 : vector<2x128xf32>
    %24 = arith.truncf %23 : vector<2x128xf32> to vector<2x128xbf16>
    %c0_16 = arith.constant 0 : index
    %c128 = arith.constant 128 : index
    %25 = vector.load %arg3[%c0_16, %c128] : memref<128x384xbf16, #tpu.memory_space<vmem>>, vector<128x128xbf16>
    %cst_17 = arith.constant dense<0.000000e+00> : vector<2x128xf32>
    %26 = tpu.matmul %24, %25, %cst_17 {dimension_numbers = #tpu.dot_dimension_numbers<[1], [0], [0], [1], [0, 0, 1, 1], [], []>} : vector<2x128xbf16>, vector<128x128xbf16>, vector<2x128xf32> -> vector<2x128xf32>
    %c0_18 = arith.constant 0 : index
    %c512 = arith.constant 512 : index
    %27 = vector.load %arg4[%c0_18, %c512] : memref<1x768xf32, #tpu.memory_space<vmem>>, vector<1x128xf32>
    %28 = vector.broadcast %27 : vector<1x128xf32> to vector<2x128xf32>
    %29 = arith.addf %26, %28 : vector<2x128xf32>
    %cst_19 = arith.constant 0.000000e+00 : f32
    %30 = vector.broadcast %cst_19 : f32 to vector<2x128xf32>
    %31 = arith.maximumf %29, %30 : vector<2x128xf32>
    %32 = arith.truncf %31 : vector<2x128xf32> to vector<2x128xbf16>
    %c0_20 = arith.constant 0 : index
    %c256_21 = arith.constant 256 : index
    %33 = vector.load %arg3[%c0_20, %c256_21] : memref<128x384xbf16, #tpu.memory_space<vmem>>, vector<128x128xbf16>
    %cst_22 = arith.constant dense<0.000000e+00> : vector<2x128xf32>
    %34 = tpu.matmul %32, %33, %cst_22 {dimension_numbers = #tpu.dot_dimension_numbers<[1], [0], [0], [1], [0, 0, 1, 1], [], []>} : vector<2x128xbf16>, vector<128x128xbf16>, vector<2x128xf32> -> vector<2x128xf32>
    %c0_23 = arith.constant 0 : index
    %c640 = arith.constant 640 : index
    %35 = vector.load %arg4[%c0_23, %c640] : memref<1x768xf32, #tpu.memory_space<vmem>>, vector<1x128xf32>
    %36 = vector.broadcast %35 : vector<1x128xf32> to vector<2x128xf32>
    %37 = arith.addf %34, %36 : vector<2x128xf32>
    %c0_24 = arith.constant 0 : index
    %c0_25 = arith.constant 0 : index
    %38 = vector.load %arg5[%c0_24, %c0_25] : memref<2x128xf32, #tpu.memory_space<vmem>>, vector<2x128xf32>
    tpu.vector_store %arg5[%c0_24, %c0_25], %37 {strides = array<i32>} : memref<2x128xf32, #tpu.memory_space<vmem>>, vector<2x128xf32>,
    return
  }
}

</mosaic_0001>

<bundles_post_ra>
// kernel: _dis_modality_jit.1
= control target key start
LH: loop header
LB: loop body
LE: loop exit
PB: predicated region body
PF: predicated region fallthrough
CT: control target
= control target key end

     0   :  { %10 = vsyncpa [#allocation3], 0  ;;  %s2379_s0 = inlined_call_operand.vmem [shape: bf16[2,1024], index: 0, kind: input, shape index: {}]   ;;  %s2380_s1 = inlined_call_operand.hbm [shape: bf16[1024,256], index: 1, kind: input, shape index: {}]   ;;  %s2381_s2 = inlined_call_operand.hbm [shape: bf16[256,128], index: 2, kind: input, shape index: {}]   ;;  %s2382_s3 = inlined_call_operand.vmem [shape: bf16[128,384], index: 3, kind: input, shape index: {}]   ;;  %s2383_s4 = inlined_call_operand.vmem [shape: f32[1,768], index: 4, kind: input, shape index: {}]   ;;  %s2384_s5 = inlined_call_operand.vmem [shape: f32[2,128], index: 5, kind: output, shape index: {}]  }
   0x1   :  { %11 = vsyncpa [#allocation5], 0  ;;  %s2160_s18 = smov [#allocation2]   ;;  %s2112_s22 = scalar_lea.hbm %s2380_s1, 16384 }
   0x2   :  { %s19_s19 = sshll.u32 %s2160_s18, 4  ;;  %p2113_p0 = scmp.ne.s32.totalorder %s2380_s1, %s2112_s22  ;;  %s20_s19 = int_to_ptr.vmem [resolvable:$true] %s19_s19 }
   0x3   :  { %p2116_p1 = scmp.lt.u32.totalorder %s2112_s22, %s2380_s1 }
   0x5   :  { %p2118_p2 = pnand %p2116_p1, %p2113_p0 }
   0x7   :  { %2121 = shalt.err (!%p2118_p2)
}
   0x8   :  { %s2122_s27 = scalar_lea.vmem %s20_s19, 16384  ;;  %p2127_p4 = scmp.lt.s32.totalorder %s20_s19, %s20_s19 }
   0x9   :  { %p2123_p3 = scmp.ne.s32.totalorder %s20_s19, %s2122_s27  ;;  %p2128_p5 = scmp.lt.s32.totalorder %s2122_s27, %s2122_s27 }
   0xb   :  { %p2129_p6 = por %p2128_p5, %p2127_p4 }
   0xd   :  { %p2130_p7 = pnand %p2129_p6, %p2123_p3 }
   0xf   :  { %2133 = shalt.err (!%p2130_p7)
}
  0x10   :  { %s2161_s28 = smov 128   ;;  %s2162_s29 = smov 8  }
  0x11   :  { %25 = dma.hbm_to_vmem [thread:$0]  %s2380_s1, 16384, %s20_s19, [#allocation3], %s2161_s28, %s2161_s28, %s2162_s29  }
  0x12   :  { %s2163_s7 = smov [#allocation4]   ;;  %s2134_s11 = scalar_lea.hbm %s2381_s2, 2048 }
  0x13   :  { %s31_s8 = sshll.u32 %s2163_s7, 4  ;;  %p2135_p8 = scmp.ne.s32.totalorder %s2381_s2, %s2134_s11  ;;  %s32_s8 = int_to_ptr.vmem [resolvable:$true] %s31_s8 }
  0x14   :  { %p2138_p9 = scmp.lt.u32.totalorder %s2134_s11, %s2381_s2 }
  0x16   :  { %p2140_p10 = pnand %p2138_p9, %p2135_p8 }
  0x18   :  { %2143 = shalt.err (!%p2140_p10)
}
  0x19   :  { %s2144_s16 = scalar_lea.vmem %s32_s8, 2048  ;;  %p2149_p12 = scmp.lt.s32.totalorder %s32_s8, %s32_s8 }
  0x1a   :  { %p2145_p11 = scmp.ne.s32.totalorder %s32_s8, %s2144_s16  ;;  %p2150_p13 = scmp.lt.s32.totalorder %s2144_s16, %s2144_s16 }
  0x1c   :  { %p2151_p0 = por %p2150_p13, %p2149_p12 }
  0x1e   :  { %p2152_p1 = pnand %p2151_p0, %p2145_p11 }
  0x20   :  { %2155 = shalt.err (!%p2152_p1)
}
  0x21   :  { %s2164_s1 = smov 64   ;;  %s2165_s17 = smov 4  }
  0x22   :  { %37 = dma.hbm_to_vmem [thread:$0]  %s2381_s2, 2048, %s32_s8, [#allocation5], %s2164_s1, %s2164_s1, %s2165_s17  }
  0x23   :  { %2156 = dma.done.wait [#allocation3], 16384  }
  0x24   :  { %2157 = vsyncadd [#allocation3], 4294950912 }
  0x25   :  { %2158 = dma.done.wait [#allocation5], 2048  }
  0x26   :  { %2159 = vsyncadd [#allocation5], 4294965248  ;;  %v1879_v0 = vld [vmem:[#allocation2 + $0x104] ss:$8 sps:$4 sm:$0xff]   ;;  %v1881_v1 = vld [vmem:[#allocation2 + $0x100] ss:$8 sps:$4 sm:$0xff]   ;;  %v180_v7 = vlaneseq }
  0x27   :  { %929 = vmatprep.subr.bf16.mxu0 %v1879_v0  ;;  %v1882_v2 = vld [vmem:[#allocation2 + $0x114] ss:$8 sps:$4 sm:$0xff]   ;;  %v1884_v3 = vld [vmem:[#allocation2 + $0x110] ss:$8 sps:$4 sm:$0xff]   ;;  %v1885_v4 = vld [vmem:[#allocation2 + $0x124] ss:$8 sps:$4 sm:$0xff]  }
  0x28   :  { %930 = vmatpush1.bf16.msra.mxu0 %v1881_v1  ;;  %v1887_v5 = vld [vmem:[#allocation2 + $0x120] ss:$8 sps:$4 sm:$0xff]   ;;  %v1888_v6 = vld [vmem:[#allocation2 + $0x134] ss:$8 sps:$4 sm:$0xff]   ;;  %v2166_v8 = vmov 1966171168  }
  0x29   :  { %931 = vmatprep.subr.bf16.mxu0 %v1882_v2  ;;  %v193_v9 = vunpack.c.l.s4 %v2166_v8  ;;  %v1890_v10 = vld [vmem:[#allocation2 + $0x130] ss:$8 sps:$4 sm:$0xff]   ;;  %v1891_v11 = vld [vmem:[#allocation2 + $0x144] ss:$8 sps:$4 sm:$0xff]   ;;  %v2223_v12 = vshrl.u32 %v180_v7, 7  ;;  %vm2168_vm0 = vmmov 0  }
  0x2a   :  { %v1893_v14 = vld [vmem:[#allocation2 + $0x140] ss:$8 sps:$4 sm:$0xff]   ;;  %v1894_v15 = vld [vmem:[#allocation2 + $0x154] ss:$8 sps:$4 sm:$0xff]   ;;  %v1896_v17 = vld [vmem:[#allocation2 + $0x150] ss:$8 sps:$4 sm:$0xff]  }
  0x2b   :  { %v194_v13 = vunpack.c.0.s8 %v193_v9  ;;  %v1897_v18 = vld [vmem:[#allocation2 + $0x164] ss:$8 sps:$4 sm:$0xff]   ;;  %v1899_v22 = vld [vmem:[#allocation2 + $0x160] ss:$8 sps:$4 sm:$0xff]   ;;  %v1900_v23 = vld [vmem:[#allocation2 + $0x174] ss:$8 sps:$4 sm:$0xff]  }
  0x2c   :  { %932 = vmatpush1.bf16.msra.mxu0 %v1884_v3  ;;  %v49_v19 = vld [vmem:[%s2379_s0] sm:$0xff]  ;;  %v1902_v28 = vld [vmem:[#allocation2 + $0x170] ss:$8 sps:$4 sm:$0xff]   ;;  %v1906_v32 = vld [vmem:[#allocation2 + $0x194] ss:$8 sps:$4 sm:$0xff]  }
  0x2d   :  { %933 = vmatprep.subr.bf16.mxu0 %v1885_v4  ;;  %v2226_v16 = vsub.s32 %v194_v13, %v2223_v12  ;;  %v191_v20 = vcombine.high %v49_v19, %v49_v19  ;;  %v1903_v29 = vld [vmem:[#allocation2 + $0x184] ss:$8 sps:$4 sm:$0xff]   ;;  %v1905_v31 = vld [vmem:[#allocation2 + $0x180] ss:$8 sps:$4 sm:$0xff]   ;;  %v1908_v33 = vld [vmem:[#allocation2 + $0x190] ss:$8 sps:$4 sm:$0xff]  }
  0x2e   :  { %v1909_v34 = vld [vmem:[#allocation2 + $0x1a4] ss:$8 sps:$4 sm:$0xff]   ;;  %v1911_v35 = vld [vmem:[#allocation2 + $0x1a0] ss:$8 sps:$4 sm:$0xff]   ;;  %v1912_v36 = vld [vmem:[#allocation2 + $0x1b4] ss:$8 sps:$4 sm:$0xff]  }
  0x2f   :  { %v198_v21 = vrot.slane %v49_v19, %v2226_v16  ;;  %v2233_v25 = vrot.slane %v191_v20, %v2226_v16  ;;  %v1973_v37 = vld [vmem:[#allocation2 + $0x4] ss:$8 sps:$4 sm:$0xff]   ;;  %v1975_v38 = vld [vmem:[#allocation2] ss:$8 sps:$4 sm:$0xff]   ;;  %v1914_v39 = vld [vmem:[#allocation2 + $0x1b0] ss:$8 sps:$4 sm:$0xff]  }
  0x30   :  { %934 = vmatpush1.bf16.msra.mxu0 %v1887_v5  ;;  %v1915_v40 = vld [vmem:[#allocation2 + $0x1c4] ss:$8 sps:$4 sm:$0xff]   ;;  %888 = vmatprep.subr.bf16.mxu1 %v1973_v37  ;;  %v1979_v41 = vld [vmem:[#allocation2 + $0x14] ss:$8 sps:$4 sm:$0xff]   ;;  %v1981_v42 = vld [vmem:[#allocation2 + $0x10] ss:$8 sps:$4 sm:$0xff]  }
  0x31   :  { %935 = vmatprep.subr.bf16.mxu0 %v1888_v6  ;;  %v206_v24 = vcombine.high %v198_v21, %v198_v21  ;;  %v2238_v27 = vrot.slane %v2233_v25, %v2226_v16  ;;  %889 = vmatpush1.bf16.msra.mxu1 %v1975_v38  ;;  %v1917_v43 = vld [vmem:[#allocation2 + $0x1c0] ss:$8 sps:$4 sm:$0xff]   ;;  %v1985_v44 = vld [vmem:[#allocation2 + $0x24] ss:$8 sps:$4 sm:$0xff]   ;;  %v1918_v45 = vld [vmem:[#allocation2 + $0x1d4] ss:$8 sps:$4 sm:$0xff]   ;;  %v2241_v55 = vrot.slane %v198_v21, %v2226_v16 }
  0x32   :  { %890 = vmatprep.subr.bf16.mxu1 %v1979_v41  ;;  %v1987_v46 = vld [vmem:[#allocation2 + $0x20] ss:$8 sps:$4 sm:$0xff]   ;;  %v1991_v47 = vld [vmem:[#allocation2 + $0x34] ss:$8 sps:$4 sm:$0xff]   ;;  %v1920_v48 = vld [vmem:[#allocation2 + $0x1d0] ss:$8 sps:$4 sm:$0xff]   ;;  %v207_v58 = vcombine.high %v2233_v25, %v2233_v25 }
  0x33   :  { %v228_v26 = vrot.slane %v206_v24, %v2226_v16  ;;  %v1921_v49 = vld [vmem:[#allocation2 + $0x1e4] ss:$8 sps:$4 sm:$0xff]   ;;  %v1993_v50 = vld [vmem:[#allocation2 + $0x30] ss:$8 sps:$4 sm:$0xff]   ;;  %v1923_v52 = vld [vmem:[#allocation2 + $0x1e0] ss:$8 sps:$4 sm:$0xff]   ;;  %v236_v61 = vcombine.high %v2241_v55, %v2241_v55 }
  0x34   :  { %936 = vmatpush1.bf16.msra.mxu0 %v1890_v10  ;;  %v1997_v51 = vld [vmem:[#allocation2 + $0x44] ss:$8 sps:$4 sm:$0xff]   ;;  %v1924_v53 = vld [vmem:[#allocation2 + $0x1f4] ss:$8 sps:$4 sm:$0xff]   ;;  %v1999_v54 = vld [vmem:[#allocation2 + $0x40] ss:$8 sps:$4 sm:$0xff]   ;;  %v2248_v0 = vrot.slane %v207_v58, %v2226_v16 }
  0x35   :  { %937 = vmatprep.subr.bf16.mxu0 %v1891_v11  ;;  %v238_v30 = vcombine.high %v228_v26, %v228_v26  ;;  %920 = vmatprep.mubr.bf16.mxu1 %v228_v26  ;;  %v2003_v56 = vld [vmem:[#allocation2 + $0x54] ss:$8 sps:$4 sm:$0xff]   ;;  %v1926_v57 = vld [vmem:[#allocation2 + $0x1f0] ss:$8 sps:$4 sm:$0xff]   ;;  %v1930_v59 = vld [vmem:[#allocation2 + $0x204] ss:$8 sps:$4 sm:$0xff]  }
  0x36   :  { %891 = vmatpush1.bf16.msra.mxu1 %v1981_v42  ;;  %v2005_v60 = vld [vmem:[#allocation2 + $0x50] ss:$8 sps:$4 sm:$0xff]   ;;  %v2009_v62 = vld [vmem:[#allocation2 + $0x64] ss:$8 sps:$4 sm:$0xff]   ;;  %v1928_v63 = vld [vmem:[#allocation2 + $0x200] ss:$8 sps:$4 sm:$0xff]  }
  0x37   :  { %961 = vmatprep.mubr.bf16.mxu0 %v238_v30  ;;  %892 = vmatprep.subr.bf16.mxu1 %v1985_v44  ;;  %v1933_v1 = vld [vmem:[#allocation2 + $0x214] ss:$8 sps:$4 sm:$0xff]   ;;  %v2011_v2 = vld [vmem:[#allocation2 + $0x60] ss:$8 sps:$4 sm:$0xff]   ;;  %v1931_v4 = vld [vmem:[#allocation2 + $0x210] ss:$8 sps:$4 sm:$0xff]  }
  0x38   :  { %938 = vmatpush1.bf16.msra.mxu0 %v1893_v14  ;;  %v2015_v3 = vld [vmem:[#allocation2 + $0x74] ss:$8 sps:$4 sm:$0xff]   ;;  %v1936_v5 = vld [vmem:[#allocation2 + $0x224] ss:$8 sps:$4 sm:$0xff]   ;;  %v2017_v6 = vld [vmem:[#allocation2 + $0x70] ss:$8 sps:$4 sm:$0xff]  }
  0x39   :  { %939 = vmatprep.subr.bf16.mxu0 %v1894_v15  ;;  %v2021_v7 = vld [vmem:[#allocation2 + $0x84] ss:$8 sps:$4 sm:$0xff]   ;;  %v1934_v8 = vld [vmem:[#allocation2 + $0x220] ss:$8 sps:$4 sm:$0xff]   ;;  %v1939_v9 = vld [vmem:[#allocation2 + $0x234] ss:$8 sps:$4 sm:$0xff]  }
  0x3a   :  { %893 = vmatpush1.bf16.msra.mxu1 %v1987_v46  ;;  %v2023_v10 = vld [vmem:[#allocation2 + $0x80] ss:$8 sps:$4 sm:$0xff]   ;;  %v2027_v11 = vld [vmem:[#allocation2 + $0x94] ss:$8 sps:$4 sm:$0xff]   ;;  %v1937_v13 = vld [vmem:[#allocation2 + $0x230] ss:$8 sps:$4 sm:$0xff]  }
  0x3b   :  { %894 = vmatprep.subr.bf16.mxu1 %v1991_v47  ;;  %v1942_v14 = vld [vmem:[#allocation2 + $0x244] ss:$8 sps:$4 sm:$0xff]   ;;  %v2029_v15 = vld [vmem:[#allocation2 + $0x90] ss:$8 sps:$4 sm:$0xff]   ;;  %v2035_v19 = vld [vmem:[#allocation2 + $0xa0] ss:$8 sps:$4 sm:$0xff]  }
  0x3c   :  { %940 = vmatpush1.bf16.msra.mxu0 %v1896_v17  ;;  %v2033_v16 = vld [vmem:[#allocation2 + $0xa4] ss:$8 sps:$4 sm:$0xff]   ;;  %v1940_v17 = vld [vmem:[#allocation2 + $0x240] ss:$8 sps:$4 sm:$0xff]   ;;  %v2039_v20 = vld [vmem:[#allocation2 + $0xb4] ss:$8 sps:$4 sm:$0xff]  }
  0x3d   :  { %941 = vmatprep.subr.bf16.mxu0 %v1897_v18  ;;  %v1945_v18 = vld [vmem:[#allocation2 + $0x254] ss:$8 sps:$4 sm:$0xff]   ;;  %v1943_v21 = vld [vmem:[#allocation2 + $0x250] ss:$8 sps:$4 sm:$0xff]   ;;  %v2045_v24 = vld [vmem:[#allocation2 + $0xc4] ss:$8 sps:$4 sm:$0xff]  }
  0x3e   :  { %895 = vmatpush1.bf16.msra.mxu1 %v1993_v50  ;;  %v1946_v25 = vld [vmem:[#allocation2 + $0x260] ss:$8 sps:$4 sm:$0xff]   ;;  %v1951_v26 = vld [vmem:[#allocation2 + $0x274] ss:$8 sps:$4 sm:$0xff]   ;;  %v1949_v30 = vld [vmem:[#allocation2 + $0x270] ss:$8 sps:$4 sm:$0xff]  }
  0x3f   :  { %896 = vmatprep.subr.bf16.mxu1 %v1997_v51  ;;  %v2063_v37 = vld [vmem:[#allocation2 + $0xf4] ss:$8 sps:$4 sm:$0xff]   ;;  %v1955_v38 = vld [vmem:[#allocation2 + $0x290] ss:$8 sps:$4 sm:$0xff]   ;;  %v2072_v41 = vld [vmem:[#allocation4 + $0x40] sm:$0xff]  }
  0x40   :  { %942 = vmatpush1.bf16.msra.mxu0 %v1899_v22  ;;  %v1948_v22 = vld [vmem:[#allocation2 + $0x264] ss:$8 sps:$4 sm:$0xff]   ;;  %v1958_v42 = vld [vmem:[#allocation2 + $0x2a0] ss:$8 sps:$4 sm:$0xff]   ;;  %v1961_v46 = vld [vmem:[#allocation2 + $0x2b0] ss:$8 sps:$4 sm:$0xff]  }
  0x41   :  { %943 = vmatprep.subr.bf16.mxu0 %v1900_v23  ;;  %v2041_v23 = vld [vmem:[#allocation2 + $0xb0] ss:$8 sps:$4 sm:$0xff]   ;;  %v2073_v44 = vld [vmem:[#allocation4] sm:$0xff]   ;;  %v1969_v51 = vld [vmem:[#allocation2 + $0x2d4] ss:$8 sps:$4 sm:$0xff]  }
  0x42   :  { %897 = vmatpush1.bf16.msra.mxu1 %v1999_v54  ;;  %v1966_v47 = vld [vmem:[#allocation2 + $0x2c4] ss:$8 sps:$4 sm:$0xff]   ;;  %v1964_v50 = vld [vmem:[#allocation2 + $0x2c0] ss:$8 sps:$4 sm:$0xff]   ;;  %v1967_v54 = vld [vmem:[#allocation2 + $0x2d0] ss:$8 sps:$4 sm:$0xff]  }
  0x43   :  { %898 = vmatprep.subr.bf16.mxu1 %v2003_v56  ;;  %v1972_v56 = vld [vmem:[#allocation2 + $0x2e4] ss:$8 sps:$4 sm:$0xff]  }
  0x44   :  { %944 = vmatpush1.bf16.msra.mxu0 %v1902_v28  ;;  %v2047_v28 = vld [vmem:[#allocation2 + $0xc0] ss:$8 sps:$4 sm:$0xff]  }
  0x45   :  { %945 = vmatprep.subr.bf16.mxu0 %v1903_v29  ;;  %v2051_v29 = vld [vmem:[#allocation2 + $0xd4] ss:$8 sps:$4 sm:$0xff]   ;;  %v2080_v58 = vld [vmem:[#allocation4 + $0x60] sm:$0xff]  }
  0x46   :  { %899 = vmatpush1.bf16.msra.mxu1 %v2005_v60  ;;  %v2081_v60 = vld [vmem:[#allocation4 + $0x20] sm:$0xff]  }
  0x47   :  { %900 = vmatprep.subr.bf16.mxu1 %v2009_v62  ;;  %v1984_v62 = vld [vmem:[#allocation2 + $0x304] ss:$8 sps:$4 sm:$0xff]  }
  0x48   :  { %946 = vmatpush1.bf16.msra.mxu0 %v1905_v31  ;;  %v1954_v31 = vld [vmem:[#allocation2 + $0x284] ss:$8 sps:$4 sm:$0xff]  }
  0x49   :  { %947 = vmatprep.subr.bf16.mxu0 %v1906_v32  ;;  %v1952_v32 = vld [vmem:[#allocation2 + $0x280] ss:$8 sps:$4 sm:$0xff]  }
  0x4a   :  { %901 = vmatpush1.bf16.msra.mxu1 %v2011_v2  ;;  %v1990_v2 = vld [vmem:[#allocation2 + $0x314] ss:$8 sps:$4 sm:$0xff]  }
  0x4b   :  { %902 = vmatprep.subr.bf16.mxu1 %v2015_v3  ;;  %v1988_v3 = vld [vmem:[#allocation2 + $0x310] ss:$8 sps:$4 sm:$0xff]  }
  0x4c   :  { %948 = vmatpush1.bf16.msra.mxu0 %v1908_v33  ;;  %v2053_v33 = vld [vmem:[#allocation2 + $0xd0] ss:$8 sps:$4 sm:$0xff]  }
  0x4d   :  { %949 = vmatprep.subr.bf16.mxu0 %v1909_v34  ;;  %v2057_v34 = vld [vmem:[#allocation2 + $0xe4] ss:$8 sps:$4 sm:$0xff]  }
  0x4e   :  { %903 = vmatpush1.bf16.msra.mxu1 %v2017_v6  ;;  %v2002_v6 = vld [vmem:[#allocation2 + $0x334] ss:$8 sps:$4 sm:$0xff]  }
  0x4f   :  { %904 = vmatprep.subr.bf16.mxu1 %v2021_v7  ;;  %v2000_v7 = vld [vmem:[#allocation2 + $0x330] ss:$8 sps:$4 sm:$0xff]  }
  0x50   :  { %950 = vmatpush1.bf16.msra.mxu0 %v1911_v35  ;;  %v1957_v35 = vld [vmem:[#allocation2 + $0x294] ss:$8 sps:$4 sm:$0xff]  }
  0x51   :  { %951 = vmatprep.subr.bf16.mxu0 %v1912_v36  ;;  %v2059_v36 = vld [vmem:[#allocation2 + $0xe0] ss:$8 sps:$4 sm:$0xff]  }
  0x52   :  { %905 = vmatpush1.bf16.msra.mxu1 %v2023_v10  ;;  %v2012_v10 = vld [vmem:[#allocation2 + $0x350] ss:$8 sps:$4 sm:$0xff]  }
  0x53   :  { %906 = vmatprep.subr.bf16.mxu1 %v2027_v11  ;;  %v2020_v11 = vld [vmem:[#allocation2 + $0x364] ss:$8 sps:$4 sm:$0xff]  }
  0x54   :  { %952 = vmatpush1.bf16.msra.mxu0 %v1914_v39  ;;  %v1960_v39 = vld [vmem:[#allocation2 + $0x2a4] ss:$8 sps:$4 sm:$0xff]  }
  0x55   :  { %953 = vmatprep.subr.bf16.mxu0 %v1915_v40  ;;  %v2065_v40 = vld [vmem:[#allocation2 + $0xf0] ss:$8 sps:$4 sm:$0xff]  }
  0x56   :  { %907 = vmatpush1.bf16.msra.mxu1 %v2029_v15  ;;  %v2024_v15 = vld [vmem:[#allocation2 + $0x370] ss:$8 sps:$4 sm:$0xff]  }
  0x57   :  { %908 = vmatprep.subr.bf16.mxu1 %v2033_v16  ;;  %v2032_v16 = vld [vmem:[#allocation2 + $0x384] ss:$8 sps:$4 sm:$0xff]  }
  0x58   :  { %954 = vmatpush1.bf16.msra.mxu0 %v1917_v43  ;;  %v1963_v43 = vld [vmem:[#allocation2 + $0x2b4] ss:$8 sps:$4 sm:$0xff]  }
  0x59   :  { %955 = vmatprep.subr.bf16.mxu0 %v1918_v45  ;;  %v2074_v45 = vld [vmem:[#allocation4 + $0x48] sm:$0xff]  }
  0x5a   :  { %909 = vmatpush1.bf16.msra.mxu1 %v2035_v19  ;;  %v2036_v19 = vld [vmem:[#allocation2 + $0x390] ss:$8 sps:$4 sm:$0xff]  }
  0x5b   :  { %910 = vmatprep.subr.bf16.mxu1 %v2039_v20  ;;  %v2044_v20 = vld [vmem:[#allocation2 + $0x3a4] ss:$8 sps:$4 sm:$0xff]  }
  0x5c   :  { %956 = vmatpush1.bf16.msra.mxu0 %v1920_v48  ;;  %v2075_v48 = vld [vmem:[#allocation4 + $0x8] sm:$0xff]  }
  0x5d   :  { %957 = vmatprep.subr.bf16.mxu0 %v1921_v49  ;;  %v2076_v49 = vld [vmem:[#allocation4 + $0x50] sm:$0xff]  }
  0x5e   :  { %911 = vmatpush1.bf16.msra.mxu1 %v2041_v23  ;;  %v2048_v23 = vld [vmem:[#allocation2 + $0x3b0] ss:$8 sps:$4 sm:$0xff]  }
  0x5f   :  { %912 = vmatprep.subr.bf16.mxu1 %v2045_v24  ;;  %v2056_v24 = vld [vmem:[#allocation2 + $0x3c4] ss:$8 sps:$4 sm:$0xff]  }
  0x60   :  { %958 = vmatpush1.bf16.msra.mxu0 %v1923_v52  ;;  %v2077_v52 = vld [vmem:[#allocation4 + $0x10] sm:$0xff]  }
  0x61   :  { %959 = vmatprep.subr.bf16.mxu0 %v1924_v53  ;;  %v2078_v53 = vld [vmem:[#allocation4 + $0x58] sm:$0xff]  }
  0x62   :  { %913 = vmatpush1.bf16.msra.mxu1 %v2047_v28  ;;  %v2060_v28 = vld [vmem:[#allocation2 + $0x3d0] ss:$8 sps:$4 sm:$0xff]  }
  0x63   :  { %914 = vmatprep.subr.bf16.mxu1 %v2051_v29  ;;  %v2068_v29 = vld [vmem:[#allocation2 + $0x3e4] ss:$8 sps:$4 sm:$0xff]  }
  0x64   :  { %960 = vmatpush1.bf16.msra.mxu0 %v1926_v57  ;;  %v2079_v57 = vld [vmem:[#allocation4 + $0x18] sm:$0xff]  }
  0x65   :  { %970 = vmatprep.subr.bf16.mxu0 %v1930_v59  ;;  %v1978_v59 = vld [vmem:[#allocation2 + $0x2f4] ss:$8 sps:$4 sm:$0xff]  }
  0x66   :  { %915 = vmatpush1.bf16.msra.mxu1 %v2053_v33  ;;  %v237_v33 = vcombine.high %v2238_v27, %v2238_v27 }
  0x67   :  { %962 = vmatmul.mubr.bf16.vlgmr.msra.gmra.mrb[0].mxu0 %v236_v61  ;;  %916 = vmatprep.subr.bf16.mxu1 %v2057_v34  ;;  %v1976_v61 = vld [vmem:[#allocation2 + $0x2f0] ss:$8 sps:$4 sm:$0xff]   ;;  %v2082_v34 = vld [vmem:[#allocation4 + $0x68] sm:$0xff]  }
  0x68   :  { %971 = vmatpush1.bf16.msra.mxu0 %v1928_v63  ;;  %1002 = vmatprep.mubr.bf16.mxu0 %v2248_v0  ;;  %v1982_v63 = vld [vmem:[#allocation2 + $0x300] ss:$8 sps:$4 sm:$0xff]  }
  0x69   :  { %972 = vmatprep.subr.bf16.mxu0 %v1933_v1  ;;  %v239_v1 = vcombine.high %v2248_v0, %v2248_v0  ;;  %v2014_v0 = vld [vmem:[#allocation2 + $0x354] ss:$8 sps:$4 sm:$0xff]  }
  0x6a   :  { %917 = vmatpush1.bf16.msra.mxu1 %v2059_v36  ;;  %v2084_v36 = vld [vmem:[#allocation4 + $0x70] sm:$0xff]  }
  0x6b   :  { %918 = vmatprep.subr.bf16.mxu1 %v2063_v37  ;;  %v2085_v37 = vld [vmem:[#allocation4 + $0x30] sm:$0xff]  }
  0x6c   :  { %973 = vmatpush1.bf16.msra.mxu0 %v1931_v4  ;;  %v1996_v4 = vld [vmem:[#allocation2 + $0x324] ss:$8 sps:$4 sm:$0xff]  }
  0x6d   :  { %974 = vmatprep.subr.bf16.mxu0 %v1936_v5  ;;  %v1994_v5 = vld [vmem:[#allocation2 + $0x320] ss:$8 sps:$4 sm:$0xff]  }
  0x6e   :  { %919 = vmatpush1.bf16.msra.mxu1 %v2065_v40  ;;  %v2167_v40 = vmov 0.0  }
  0x6f   :  { %1749 = vmatprep.subr.bf16.mxu1 %v2072_v41 }
  0x70   :  { %975 = vmatpush1.bf16.msra.mxu0 %v1934_v8  ;;  %v2008_v8 = vld [vmem:[#allocation2 + $0x344] ss:$8 sps:$4 sm:$0xff]  }
  0x71   :  { %976 = vmatprep.subr.bf16.mxu0 %v1939_v9  ;;  %921 = vmatmul.mubr.bf16.vlgmr.msra.gmra.mrb[0].mxu1 %v2241_v55  ;;  %v1970_v55 = vld [vmem:[#allocation2 + $0x2e0] ss:$8 sps:$4 sm:$0xff]  }
  0x72   :  { %1750 = vmatpush3.bf16.msra.mxu1 %v2073_v44  ;;  %v2006_v9 = vld [vmem:[#allocation2 + $0x340] ss:$8 sps:$4 sm:$0xff]   ;;  %v182_v44 = vsub.s32 0, %v2223_v12 }
  0x73   :  { %1751 = vmatprep.subr.bf16.mxu1 %v2074_v45  ;;  %v178_v45 = vld [vmem:[%s2383_s4] sm:$0x3] }
  0x74   :  { %977 = vmatpush1.bf16.msra.mxu0 %v1937_v13  ;;  %v2018_v13 = vld [vmem:[#allocation2 + $0x360] ss:$8 sps:$4 sm:$0xff]  }
  0x75   :  { %978 = vmatprep.subr.bf16.mxu0 %v1942_v14  ;;  %v2026_v14 = vld [vmem:[#allocation2 + $0x374] ss:$8 sps:$4 sm:$0xff]  }
  0x76   :  { %1752 = vmatpush3.bf16.msra.mxu1 %v2075_v48 }
  0x77   :  { %1753 = vmatprep.subr.bf16.mxu1 %v2076_v49 }
  0x78   :  { %979 = vmatpush1.bf16.msra.mxu0 %v1940_v17  ;;  %v2030_v17 = vld [vmem:[#allocation2 + $0x380] ss:$8 sps:$4 sm:$0xff]  }
  0x79   :  { %980 = vmatprep.subr.bf16.mxu0 %v1945_v18  ;;  %v2038_v18 = vld [vmem:[#allocation2 + $0x394] ss:$8 sps:$4 sm:$0xff]  }
  0x7a   :  { %1754 = vmatpush3.bf16.msra.mxu1 %v2077_v52 }
  0x7b   :  { %1755 = vmatprep.subr.bf16.mxu1 %v2078_v53 }
  0x7c   :  { %981 = vmatpush1.bf16.msra.mxu0 %v1943_v21  ;;  %v2042_v21 = vld [vmem:[#allocation2 + $0x3a0] ss:$8 sps:$4 sm:$0xff]  }
  0x7d   :  { %982 = vmatprep.subr.bf16.mxu0 %v1948_v22  ;;  %v2050_v22 = vld [vmem:[#allocation2 + $0x3b4] ss:$8 sps:$4 sm:$0xff]  }
  0x7e   :  { %1756 = vmatpush3.bf16.msra.mxu1 %v2079_v57 }
  0x7f   :  { %1757 = vmatprep.subr.bf16.mxu1 %v2080_v58 }
  0x80   :  { %983 = vmatpush1.bf16.msra.mxu0 %v1946_v25  ;;  %v2054_v25 = vld [vmem:[#allocation2 + $0x3c0] ss:$8 sps:$4 sm:$0xff]  }
  0x81   :  { %984 = vmatprep.subr.bf16.mxu0 %v1951_v26  ;;  %v2062_v26 = vld [vmem:[#allocation2 + $0x3d4] ss:$8 sps:$4 sm:$0xff]  }
  0x82   :  { %1758 = vmatpush3.bf16.msra.mxu1 %v2081_v60  ;;  %v2088_v60 = vld [vmem:[%s2382_s3] ss:$12 sps:$4 sm:$0xff]  }
  0x83   :  { %1759 = vmatprep.subr.bf16.mxu1 %v2082_v34  ;;  %v2107_v34 = vld [vmem:[%s2382_s3 + $0x50] ss:$12 sps:$4 sm:$0xff]  }
  0x84   :  { %985 = vmatpush1.bf16.msra.mxu0 %v1949_v30  ;;  %v2066_v30 = vld [vmem:[#allocation2 + $0x3e0] ss:$8 sps:$4 sm:$0xff]  }
  0x85   :  { %986 = vmatprep.subr.bf16.mxu0 %v1954_v31  ;;  %v2071_v31 = vld [vmem:[#allocation2 + $0x3f4] ss:$8 sps:$4 sm:$0xff]  }
  0x88   :  { %987 = vmatpush1.bf16.msra.mxu0 %v1952_v32  ;;  %v2069_v32 = vld [vmem:[#allocation2 + $0x3f0] ss:$8 sps:$4 sm:$0xff]  }
  0x89   :  { %988 = vmatprep.subr.bf16.mxu0 %v1957_v35  ;;  %v2083_v35 = vld [vmem:[#allocation4 + $0x28] sm:$0xff]  }
  0x8a   :  { %1760 = vmatpush3.bf16.msra.mxu1 %v2083_v35  ;;  %v2108_v35 = vld [vmem:[%s2382_s3 + $0x68] ss:$12 sps:$4 sm:$0xff]  }
  0x8b   :  { %1761 = vmatprep.subr.bf16.mxu1 %v2084_v36  ;;  %v2109_v36 = vld [vmem:[%s2382_s3 + $0x80] ss:$12 sps:$4 sm:$0xff]  }
  0x8c   :  { %989 = vmatpush1.bf16.msra.mxu0 %v1955_v38  ;;  %v2086_v38 = vld [vmem:[#allocation4 + $0x78] sm:$0xff]  }
  0x8d   :  { %990 = vmatprep.subr.bf16.mxu0 %v1960_v39  ;;  %v2087_v39 = vld [vmem:[#allocation4 + $0x38] sm:$0xff]  }
  0x8e   :  { %1762 = vmatpush3.bf16.msra.mxu1 %v2085_v37  ;;  %v2110_v37 = vld [vmem:[%s2382_s3 + $0x98] ss:$12 sps:$4 sm:$0xff]  }
  0x8f   :  { %1763 = vmatprep.subr.bf16.mxu1 %v2086_v38  ;;  %v2111_v38 = vld [vmem:[%s2382_s3 + $0xb0] ss:$12 sps:$4 sm:$0xff]  }
  0x90   :  { %991 = vmatpush1.bf16.msra.mxu0 %v1958_v42 }
  0x91   :  { %992 = vmatprep.subr.bf16.mxu0 %v1963_v43 }
  0x92   :  { %1764 = vmatpush3.bf16.msra.mxu1 %v2087_v39  ;;  %v1731_v39 = vld [vmem:[%s2383_s4 + $0x4] ss:$0 sm:$0xff] }
  0x93   :  { %1798 = vmatprep.subr.bf16.mxu1 %v2167_v40 }
  0x94   :  { %993 = vmatpush1.bf16.msra.mxu0 %v1961_v46  ;;  %v186_v46 = vsub.s32 1, %v2223_v12  ;;  %v2089_v12 = vld [vmem:[%s2382_s3 + $0x18] ss:$12 sps:$4 sm:$0xff]  }
  0x95   :  { %994 = vmatprep.subr.bf16.mxu0 %v1966_v47  ;;  %v183_v47 = vrot.slane %v178_v45, %v182_v44 }
  0x96   :  { %v187_v48 = vrot.slane %v178_v45, %v186_v46 }
  0x98   :  { %995 = vmatpush1.bf16.msra.mxu0 %v1964_v50 }
  0x99   :  { %996 = vmatprep.subr.bf16.mxu0 %v1969_v51 }
  0x9c   :  { %997 = vmatpush1.bf16.msra.mxu0 %v1967_v54 }
  0x9d   :  { %998 = vmatprep.subr.bf16.mxu0 %v1972_v56 }
  0xa0   :  { %999 = vmatpush1.bf16.msra.mxu0 %v1970_v55 }
  0xa1   :  { %1000 = vmatprep.subr.bf16.mxu0 %v1978_v59 }
  0xa4   :  { %1001 = vmatpush1.bf16.msra.mxu0 %v1976_v61 }
  0xa5   :  { %1011 = vmatprep.subr.bf16.mxu0 %v1984_v62  ;;  %v2090_v62 = vld [vmem:[%s2382_s3 + $0x30] ss:$12 sps:$4 sm:$0xff]  }
  0xa7   :  { %1003 = vmatmul.mubr.bf16.vlgmr.msra.gmra.mrb[0].mxu0 %v2238_v27 }
  0xa8   :  { %1012 = vmatpush1.bf16.msra.mxu0 %v1982_v63  ;;  %1043 = vmatprep.mubr.bf16.mxu0 %v239_v1  ;;  %v2091_v63 = vld [vmem:[%s2382_s3 + $0x48] ss:$12 sps:$4 sm:$0xff]   ;;  %v2092_v1 = vld [vmem:[%s2382_s3 + $0x60] ss:$12 sps:$4 sm:$0xff]  }
  0xa9   :  { %1013 = vmatprep.subr.bf16.mxu0 %v1990_v2  ;;  %v2093_v2 = vld [vmem:[%s2382_s3 + $0x78] ss:$12 sps:$4 sm:$0xff]  }
  0xac   :  { %1014 = vmatpush1.bf16.msra.mxu0 %v1988_v3  ;;  %v2094_v3 = vld [vmem:[%s2382_s3 + $0x90] ss:$12 sps:$4 sm:$0xff]  }
  0xad   :  { %1015 = vmatprep.subr.bf16.mxu0 %v1996_v4  ;;  %v2095_v4 = vld [vmem:[%s2382_s3 + $0xa8] ss:$12 sps:$4 sm:$0xff]  }
  0xb0   :  { %1016 = vmatpush1.bf16.msra.mxu0 %v1994_v5 }
  0xb1   :  { %1017 = vmatprep.subr.bf16.mxu0 %v2002_v6  ;;  %v1705_v6 = vld [vmem:[%s2383_s4 + $0x2] ss:$0 sm:$0xff] }
  0xb4   :  { %1018 = vmatpush1.bf16.msra.mxu0 %v2000_v7 }
  0xb5   :  { %1019 = vmatprep.subr.bf16.mxu0 %v2008_v8 }
  0xb8   :  { %1020 = vmatpush1.bf16.msra.mxu0 %v2006_v9 }
  0xb9   :  { %1021 = vmatprep.subr.bf16.mxu0 %v2014_v0 }
  0xbc   :  { %1022 = vmatpush1.bf16.msra.mxu0 %v2012_v10 }
  0xbd   :  { %1023 = vmatprep.subr.bf16.mxu0 %v2020_v11 }
  0xc0   :  { %1024 = vmatpush1.bf16.msra.mxu0 %v2018_v13  ;;  %v2096_v13 = vld [vmem:[%s2382_s3 + $0x4] ss:$12 sps:$4 sm:$0xff]  }
  0xc1   :  { %1025 = vmatprep.subr.bf16.mxu0 %v2026_v14 }
  0xc4   :  { %1026 = vmatpush1.bf16.msra.mxu0 %v2024_v15  ;;  %v2097_v15 = vld [vmem:[%s2382_s3 + $0x1c] ss:$12 sps:$4 sm:$0xff]  }
  0xc5   :  { %1027 = vmatprep.subr.bf16.mxu0 %v2032_v16  ;;  %v2098_v16 = vld [vmem:[%s2382_s3 + $0x34] ss:$12 sps:$4 sm:$0xff]  }
  0xc8   :  { %1028 = vmatpush1.bf16.msra.mxu0 %v2030_v17  ;;  %v2099_v17 = vld [vmem:[%s2382_s3 + $0x4c] ss:$12 sps:$4 sm:$0xff]  }
  0xc9   :  { %1029 = vmatprep.subr.bf16.mxu0 %v2038_v18  ;;  %v2100_v18 = vld [vmem:[%s2382_s3 + $0x64] ss:$12 sps:$4 sm:$0xff]  }
  0xcc   :  { %1030 = vmatpush1.bf16.msra.mxu0 %v2036_v19  ;;  %v2101_v19 = vld [vmem:[%s2382_s3 + $0x7c] ss:$12 sps:$4 sm:$0xff]  }
  0xcd   :  { %1031 = vmatprep.subr.bf16.mxu0 %v2044_v20  ;;  %v2102_v20 = vld [vmem:[%s2382_s3 + $0x94] ss:$12 sps:$4 sm:$0xff]  }
  0xd0   :  { %1032 = vmatpush1.bf16.msra.mxu0 %v2042_v21  ;;  %v2103_v21 = vld [vmem:[%s2382_s3 + $0xac] ss:$12 sps:$4 sm:$0xff]  }
  0xd1   :  { %1033 = vmatprep.subr.bf16.mxu0 %v2050_v22  ;;  %v1722_v22 = vld [vmem:[%s2383_s4 + $0x3] ss:$0 sm:$0xff] }
  0xd4   :  { %1034 = vmatpush1.bf16.msra.mxu0 %v2048_v23 }
  0xd5   :  { %1035 = vmatprep.subr.bf16.mxu0 %v2056_v24 }
  0xd8   :  { %1036 = vmatpush1.bf16.msra.mxu0 %v2054_v25 }
  0xd9   :  { %1037 = vmatprep.subr.bf16.mxu0 %v2062_v26 }
  0xdc   :  { %1038 = vmatpush1.bf16.msra.mxu0 %v2060_v28 }
  0xdd   :  { %1039 = vmatprep.subr.bf16.mxu0 %v2068_v29 }
  0xe0   :  { %1040 = vmatpush1.bf16.msra.mxu0 %v2066_v30  ;;  %v2104_v30 = vld [vmem:[%s2382_s3 + $0x8] ss:$12 sps:$4 sm:$0xff]  }
  0xe1   :  { %1041 = vmatprep.subr.bf16.mxu0 %v2071_v31 }
  0xe4   :  { %1042 = vmatpush1.bf16.msra.mxu0 %v2069_v32  ;;  %v2105_v32 = vld [vmem:[%s2382_s3 + $0x20] ss:$12 sps:$4 sm:$0xff]  }
  0xe7   :  { %1044 = vmatmul.mubr.bf16.vlgmr.msra.gmra.mrb[0].mxu0 %v237_v33  ;;  %v2106_v33 = vld [vmem:[%s2382_s3 + $0x38] ss:$12 sps:$4 sm:$0xff]  }
 0x144   :  { %v922_v41 = vpop.f32.mrb[0].mxu1 }
 0x145   :  { %v924_v42 = vpop.f32.mrb[1].mxu1  ;;  %v923_v49 = vadd.f32 %v922_v41, %v183_v47 }
 0x146   :  { %v926_v27 = vpop.f32.mrb[2].mxu1  ;;  %v925_v50 = vadd.f32 %v924_v42, %v187_v48 }
 0x147   :  { %v927_v43 = vpop.f32.mrb[3].mxu1 }
 0x1ba   :  { %v1045_v51 = vpop.f32.mrb[0].mxu0 }
 0x1bb   :  { %v1859_v52 = vadd.f32 %v1045_v51, %v923_v49  ;;  %v1047_v53 = vpop.f32.mrb[1].mxu0 }
 0x1bc   :  { %v1861_v54 = vadd.f32 %v1047_v53, %v925_v50  ;;  %v1049_v56 = vpop.f32.mrb[2].mxu0 }
 0x1bd   :  { %v1052_v57 = vmax.f32 %v1859_v52, 0.0  ;;  %v1050_v58 = vpop.f32.mrb[3].mxu0 }
 0x1be   :  { %v1053_v55 = vmax.f32 %v1861_v54, 0.0 }
 0x1bf   :  { %v1054_v61 = vpack.c.bf16 %v1052_v57, %v1052_v57 }
 0x1c0   :  { %v1055_v59 = vpack.c.bf16 %v1053_v55, %v1053_v55 }
 0x1c2   :  { %1223 = vmatprep.mubr.bf16.mxu1 %v1055_v59 }
 0x1c3   :  { %1224 = vmatmul.mubr.bf16.vlgmr.msra.gmra.mrb[4].mxu1 %v1054_v61 }
 0x1c4   :  { %1799 = vmatpush3.bf16.msra.mxu1 %v2088_v60  ;;  %1814 = vmatprep.mubr.msk.bf16.mxu1 %vm2168_vm0, %v2167_v40 }
 0x1c5   :  { %1800 = vmatprep.subr.bf16.mxu1 %v2167_v40 }
 0x1c8   :  { %1801 = vmatpush3.bf16.msra.mxu1 %v2089_v12 }
 0x1c9   :  { %1802 = vmatprep.subr.bf16.mxu1 %v2167_v40 }
 0x1cc   :  { %1803 = vmatpush3.bf16.msra.mxu1 %v2090_v62 }
 0x1cd   :  { %1804 = vmatprep.subr.bf16.mxu1 %v2167_v40 }
 0x1d0   :  { %1805 = vmatpush3.bf16.msra.mxu1 %v2091_v63 }
 0x1d1   :  { %1806 = vmatprep.subr.bf16.mxu1 %v2167_v40 }
 0x1d4   :  { %1807 = vmatpush3.bf16.msra.mxu1 %v2092_v1 }
 0x1d5   :  { %1808 = vmatprep.subr.bf16.mxu1 %v2167_v40 }
 0x1d8   :  { %1809 = vmatpush3.bf16.msra.mxu1 %v2093_v2 }
 0x1d9   :  { %1810 = vmatprep.subr.bf16.mxu1 %v2167_v40 }
 0x1dc   :  { %1811 = vmatpush3.bf16.msra.mxu1 %v2094_v3 }
 0x1dd   :  { %1812 = vmatprep.subr.bf16.mxu1 %v2167_v40 }
 0x1e0   :  { %1813 = vmatpush3.bf16.msra.mxu1 %v2095_v4 }
 0x1e1   :  { %1818 = vmatprep.subr.bf16.mxu1 %v2167_v40 }
 0x296   :  { %v1765_v5 = vpop.f32.mrb[4].mxu1 }
 0x297   :  { %v1766_v7 = vpop.f32.mrb[5].mxu1 }
 0x298   :  { %v1767_v8 = vadd.f32 %v1766_v7, %v1765_v5  ;;  %v1768_v9 = vpop.f32.mrb[6].mxu1 }
 0x299   :  { %v1769_v0 = vpop.f32.mrb[7].mxu1 }
 0x29a   :  { %v1226_v10 = vadd.f32 %v1767_v8, %v1705_v6 }
 0x29c   :  { %v1231_v11 = vmax.f32 %v1226_v10, 0.0 }
 0x29e   :  { %v1232_v14 = vpack.c.bf16 %v1231_v11, %v1231_v11 }
 0x2a0   :  { %1815 = vmatmul.mubr.bf16.vlgmr.msra.gmra.mrb[8].mxu1 %v1232_v14 }
 0x2a1   :  { %1819 = vmatpush3.bf16.msra.mxu1 %v2096_v13  ;;  %1834 = vmatprep.mubr.msk.bf16.mxu1 %vm2168_vm0, %v2167_v40 }
 0x2a2   :  { %1820 = vmatprep.subr.bf16.mxu1 %v2167_v40 }
 0x2a5   :  { %1821 = vmatpush3.bf16.msra.mxu1 %v2097_v15 }
 0x2a6   :  { %1822 = vmatprep.subr.bf16.mxu1 %v2167_v40 }
 0x2a9   :  { %1823 = vmatpush3.bf16.msra.mxu1 %v2098_v16 }
 0x2aa   :  { %1824 = vmatprep.subr.bf16.mxu1 %v2167_v40 }
 0x2ad   :  { %1825 = vmatpush3.bf16.msra.mxu1 %v2099_v17 }
 0x2ae   :  { %1826 = vmatprep.subr.bf16.mxu1 %v2167_v40 }
 0x2b1   :  { %1827 = vmatpush3.bf16.msra.mxu1 %v2100_v18 }
 0x2b2   :  { %1828 = vmatprep.subr.bf16.mxu1 %v2167_v40 }
 0x2b5   :  { %1829 = vmatpush3.bf16.msra.mxu1 %v2101_v19 }
 0x2b6   :  { %1830 = vmatprep.subr.bf16.mxu1 %v2167_v40 }
 0x2b9   :  { %1831 = vmatpush3.bf16.msra.mxu1 %v2102_v20 }
 0x2ba   :  { %1832 = vmatprep.subr.bf16.mxu1 %v2167_v40 }
 0x2bd   :  { %1833 = vmatpush3.bf16.msra.mxu1 %v2103_v21 }
 0x2be   :  { %1838 = vmatprep.subr.bf16.mxu1 %v2167_v40 }
 0x373   :  { %v1338_v23 = vpop.f32.mrb[8].mxu1 }
 0x374   :  { %v1339_v24 = vadd.f32 %v1722_v22, %v1338_v23  ;;  %v1816_v25 = vpop.f32.mrb[9].mxu1 }
 0x375   :  { %v1341_v26 = vpop.f32.mrb[10].mxu1 }
 0x376   :  { %v1344_v28 = vmax.f32 %v1339_v24, 0.0  ;;  %v1817_v29 = vpop.f32.mrb[11].mxu1 }
 0x378   :  { %v1345_v31 = vpack.c.bf16 %v1344_v28, %v1344_v28 }
 0x37a   :  { %1835 = vmatmul.mubr.bf16.vlgmr.msra.gmra.mrb[12].mxu1 %v1345_v31 }
 0x37b   :  { %1839 = vmatpush3.bf16.msra.mxu1 %v2104_v30  ;;  %1854 = vmatprep.mubr.msk.bf16.mxu1 %vm2168_vm0, %v2167_v40 }
 0x37c   :  { %1840 = vmatprep.subr.bf16.mxu1 %v2167_v40 }
 0x37f   :  { %1841 = vmatpush3.bf16.msra.mxu1 %v2105_v32 }
 0x380   :  { %1842 = vmatprep.subr.bf16.mxu1 %v2167_v40 }
 0x383   :  { %1843 = vmatpush3.bf16.msra.mxu1 %v2106_v33 }
 0x384   :  { %1844 = vmatprep.subr.bf16.mxu1 %v2167_v40 }
 0x387   :  { %1845 = vmatpush3.bf16.msra.mxu1 %v2107_v34 }
 0x388   :  { %1846 = vmatprep.subr.bf16.mxu1 %v2167_v40 }
 0x38b   :  { %1847 = vmatpush3.bf16.msra.mxu1 %v2108_v35 }
 0x38c   :  { %1848 = vmatprep.subr.bf16.mxu1 %v2167_v40 }
 0x38f   :  { %1849 = vmatpush3.bf16.msra.mxu1 %v2109_v36 }
 0x390   :  { %1850 = vmatprep.subr.bf16.mxu1 %v2167_v40 }
 0x393   :  { %1851 = vmatpush3.bf16.msra.mxu1 %v2110_v37 }
 0x394   :  { %1852 = vmatprep.subr.bf16.mxu1 %v2167_v40  ;;  %v1740_v40 = vld [vmem:[%s2383_s4 + $0x5] ss:$0 sm:$0xff] }
 0x397   :  { %1853 = vmatpush3.bf16.msra.mxu1 %v2111_v38 }
 0x44d   :  { %v1451_v41 = vpop.f32.mrb[12].mxu1 }
 0x44e   :  { %v1452_v42 = vadd.f32 %v1731_v39, %v1451_v41  ;;  %v1836_v27 = vpop.f32.mrb[13].mxu1 }
 0x44f   :  { %v1454_v43 = vpop.f32.mrb[14].mxu1 }
 0x450   :  { %v1457_v44 = vmax.f32 %v1452_v42, 0.0  ;;  %v1837_v45 = vpop.f32.mrb[15].mxu1 }
 0x452   :  { %v1458_v46 = vpack.c.bf16 %v1457_v44, %v1457_v44 }
 0x454   :  { %1855 = vmatmul.mubr.bf16.vlgmr.msra.gmra.mrb[16].mxu1 %v1458_v46 }
 0x527   :  { %v1564_v47 = vpop.f32.mrb[16].mxu1 }
 0x528   :  { %v1565_v48 = vadd.f32 %v1740_v40, %v1564_v47  ;;  %v1856_v49 = vpop.f32.mrb[17].mxu1 }
 0x529   :  { %v1567_v50 = vpop.f32.mrb[18].mxu1 }
 0x52a   :  { %1570 = vst [vmem:[%s2384_s5] sm:$0x3] %v1565_v48  ;;  %v1857_v51 = vpop.f32.mrb[19].mxu1 }
 0x52b   :  { %1575 = vsyncpa [#allocation3], 1 }
 0x52c   :  { %1576 = vsyncpa [#allocation5], 1 }

</bundles_post_ra>
